<compile_context>
chip_gen: v7x
topology: tpu7x:2x2x1
jax: 0.10.0
libtpu: 0.0.40
codegen_flags: <defaults>
</compile_context>

<pallas_src>
import jax
import jax.numpy as jnp
from jax.experimental import pallas as pl
from jax.experimental.pallas import tpu as pltpu

LN_EPS = 1e-5  # PyTorch nn.LayerNorm default


def _round_up(x, m):
    return (x + m - 1) // m * m


def _vmem_capacity_bytes():
    """Physical per-core VMEM; conservative 64 MiB default if the query fails."""
    try:
        cap = int(pltpu.get_tpu_info().vmem_capacity_bytes)
        if cap > 0:
            return cap
    except Exception:
        pass
    return 64 * 1024 * 1024


def _tn_candidates(D):
    """Full D first (weight resident), then 256-multiples, then 128-multiples dividing D."""
    cands = [D]
    if D % 128 == 0:
        for step in (256, 128):
            c = (D // step) * step - step
            while c >= step:
                if D % c == 0 and c not in cands:
                    cands.append(c)
                c -= step
    # TODO(synk): very large D with D % 128 != 0 cannot be column-tiled here (would need
    # N-padding of the weight); it falls back to tn == D.
    return cands


def _choose_tiles(R, D, xsz, wsz, osz, budget, tm_req, pack):
    """Pick (tm, tn) so the double-buffered working set fits in `budget` bytes."""

    def fits(tm, tn):
        n_j = 1 if tn >= D else -(-D // tn)
        w_buf = (1 if n_j == 1 else 2) * D * tn * wsz      # single-buffered when invariant
        x_buf = 2 * tm * D * xsz                           # streamed rows, double-buffered
        o_buf = 2 * tm * tn * osz
        misc = 8 * D * 4 + 8 * tn * 4                      # gamma/beta/bias blocks
        temps = tm * D * 4 + tm * D * wsz + tm * tn * 4    # f32 x, cast y, f32 matmul acc
        return w_buf + x_buf + o_buf + misc + temps <= budget

    # Row-tile candidates: requested tile (sublane-pack aligned), halving downwards.
    tm_cap = max(pack, _round_up(min(tm_req, max(R, 1)), pack))
    if tm_cap >= R:
        tms = [R]  # one exact row block: no masked tail, shape == full dim is always legal
    else:
        tms, t = [], tm_cap
        while True:
            tms.append(t)
            if t <= pack:
                break
            t = max(pack, _round_up(t // 2, pack))
    tns = _tn_candidates(D)

    # Pass 1: weight fully resident (tn == D), keep the row tile >= 128 when possible.
    tm_floor = min(tms[0], 128)
    for tm in tms:
        if tm < tm_floor:
            break
        if fits(tm, D):
            return tm, D
    # Pass 2: column-tiled weight, largest row tile that fits.
    for tn in tns:
        for tm in tms:
            if fits(tm, tn):
                return tm, tn
    # Pass 3: smallest tiles; let vmem_limit_bytes be the final arbiter.
    return tms[-1], tns[-1]


def prenorm_linear_kernel(x_ref, gamma_ref, beta_ref, w_ref, b_ref, o_ref):
    # x_ref: (tm, D)  gamma/beta: (1, D)  w_ref: (D, tn)  b_ref: (1, tn)  o_ref: (tm, tn)
    x = x_ref[...].astype(jnp.float32)

    # LayerNorm stats from one read of x, f32 accumulation, biased variance
    # (matches nn.LayerNorm; eps inside rsqrt). Clamp guards tiny negative rounding.
    mean = jnp.mean(x, axis=-1, keepdims=True)
    mean_sq = jnp.mean(x * x, axis=-1, keepdims=True)
    var = jnp.maximum(mean_sq - mean * mean, 0.0)
    inv = jax.lax.rsqrt(var + LN_EPS)

    g = gamma_ref[...].astype(jnp.float32)
    be = beta_ref[...].astype(jnp.float32)

    # Normalize + affine fused, cast straight to the matmul dtype (bf16 weights stay
    # bf16 -> full MXU rate); matmul accumulation stays f32.
    # Note: when the output columns are tiled (n_j > 1) the LN stats are recomputed per
    # column tile; that VPU work hides under the MXU for large D.
    y = ((x - mean) * inv * g + be).astype(w_ref.dtype)

    out = jnp.dot(y, w_ref[...], preferred_element_type=jnp.float32)
    out = out + b_ref[...].astype(jnp.float32)
    o_ref[...] = out.astype(o_ref.dtype)


def prenorm_linear(x, gamma, beta, w, b, *, tm=256):
    """Fused PreNorm(dim, Linear(dim, dim)): x [B, S, D] -> [B, S, D]."""
    B, S, D = x.shape
    R = B * S

    x2 = x.reshape(R, D)
    g2 = gamma.reshape(1, D)
    be2 = beta.reshape(1, D)
    b2 = b.reshape(1, D)

    xsz = jnp.dtype(x.dtype).itemsize
    wsz = jnp.dtype(w.dtype).itemsize
    osz = xsz

    # VMEM budgeting: leave ~20% headroom below physical (per-core on v7x), and keep the
    # tile-selection target a further 10% below the compiler limit.
    cap = _vmem_capacity_bytes()
    vmem_limit = max(32 * 1024 * 1024, int(min(cap * 0.82, cap - (8 << 20))))
    budget = int(vmem_limit * 0.9)

    pack = 16 if x.dtype == jnp.bfloat16 else 8
    tm_eff, tn_eff = _choose_tiles(R, D, xsz, wsz, osz, budget, tm, pack)

    n_i = pl.cdiv(R, tm_eff)   # row tiles (inner grid axis, streamed)
    n_j = pl.cdiv(D, tn_eff)   # output-column tiles (outer grid axis)

    cost = pl.CostEstimate(
        flops=2 * R * D * D + 8 * R * D,
        transcendentals=R * n_j,
        bytes_accessed=n_j * R * D * xsz + D * D * wsz + R * D * osz + 4 * D * 4,
    )

    def _build(use_single_buffer):
        def spec(shape, imap, invariant):
            if invariant and use_single_buffer:
                return pl.BlockSpec(shape, imap, pipeline_mode=pl.Buffered(1))
            return pl.BlockSpec(shape, imap)

        # Grid = (columns outer, rows inner): the weight block index (0, j) is invariant
        # along the inner axis, so Pallas elides its re-fetch -> W streamed once per call.
        in_specs = [
            spec((tm_eff, D), lambda j, i: (i, 0), False),       # x rows (streamed)
            spec((1, D), lambda j, i: (0, 0), True),             # gamma (grid-invariant)
            spec((1, D), lambda j, i: (0, 0), True),             # beta  (grid-invariant)
            spec((D, tn_eff), lambda j, i: (0, j), n_j == 1),    # W (inner-invariant)
            spec((1, tn_eff), lambda j, i: (0, j), n_j == 1),    # bias
        ]
        out_specs = pl.BlockSpec((tm_eff, tn_eff), lambda j, i: (i, j))

        return pl.pallas_call(
            prenorm_linear_kernel,
            out_shape=jax.ShapeDtypeStruct((R, D), x.dtype),
            grid_spec=pltpu.PrefetchScalarGridSpec(
                num_scalar_prefetch=0,
                grid=(n_j, n_i),
                in_specs=in_specs,
                out_specs=out_specs,
            ),
            compiler_params=pltpu.CompilerParams(
                dimension_semantics=("parallel", "parallel"),
                vmem_limit_bytes=vmem_limit),
            cost_estimate=cost,
        )

    try:
        out2 = _build(True)(x2, g2, be2, w, b2)
    except (TypeError, ValueError, NotImplementedError, pltpu.LoweringException):
        # Narrow fallback: only if this build rejects pipeline_mode=pl.Buffered(1).
        out2 = _build(False)(x2, g2, be2, w, b2)

    return out2.reshape(B, S, D)


def prenorm_linear_ref(x, gamma, beta, w, b):
    xf = x.astype(jnp.float32)
    mean = jnp.mean(xf, axis=-1, keepdims=True)
    var = jnp.mean((xf - mean) ** 2, axis=-1, keepdims=True)
    xn = (xf - mean) * jax.lax.rsqrt(var + LN_EPS)
    y = xn * gamma.astype(jnp.float32) + beta.astype(jnp.float32)
    return (y @ w.astype(jnp.float32) + b.astype(jnp.float32)).astype(x.dtype)


if __name__ == "__main__":
    key = jax.random.PRNGKey(0)
    kx, kg, kbt, kw, kb, kx2 = jax.random.split(key, 6)

    B, S, D = 2, 8, 32
    x = jax.random.normal(kx, (B, S, D), dtype=jnp.float32)
    # LayerNorm affine (non-trivial, to exercise the in-kernel gamma/beta apply)
    gamma = 1.0 + 0.1 * jax.random.normal(kg, (D,), dtype=jnp.float32)
    beta = 0.05 * jax.random.normal(kbt, (D,), dtype=jnp.float32)
    # fn = Linear(D, D) params, deterministic synthetic init
    w = jax.random.normal(kw, (D, D), dtype=jnp.float32) * (1.0 / jnp.sqrt(D))
    b = 0.01 * jax.random.normal(kb, (D,), dtype=jnp.float32)

    out = jax.block_until_ready(prenorm_linear(x, gamma, beta, w, b))
    ref = prenorm_linear_ref(x, gamma, beta, w, b)
    assert out.shape == (B, S, D)
    assert jnp.allclose(out, ref, atol=1e-4, rtol=1e-4), "mismatch vs reference"

    # Ragged row count -> exercises the non-divisible / exact-single-block row path.
    B2, S2 = 2, 13
    x_r = jax.random.normal(kx2, (B2, S2, D), dtype=jnp.float32)
    out_r = jax.block_until_ready(prenorm_linear(x_r, gamma, beta, w, b))
    ref_r = prenorm_linear_ref(x_r, gamma, beta, w, b)
    assert out_r.shape == (B2, S2, D)
    assert jnp.allclose(out_r, ref_r, atol=1e-4, rtol=1e-4), "mismatch (ragged rows)"

    # TODO(synk): PreNorm's wrapped `fn` is arbitrary in the PyTorch module; only the
    # Linear(dim, dim) instantiation is fused here.
    print("KERNEL_OK")
</pallas_src>

<mosaic_0001>
module attributes {stable_mosaic.version = 11 : i64} {
  func.func @prenorm_linear_kernel(%arg0: i32, %arg1: i32, %arg2: memref<16x32xf32, #tpu.memory_space<vmem>>, %arg3: memref<1x32xf32, #tpu.memory_space<vmem>>, %arg4: memref<1x32xf32, #tpu.memory_space<vmem>>, %arg5: memref<32x32xf32, #tpu.memory_space<vmem>>, %arg6: memref<1x32xf32, #tpu.memory_space<vmem>>, %arg7: memref<16x32xf32, #tpu.memory_space<vmem>>) attributes {dimension_semantics = [#tpu.dimension_semantics<parallel>, #tpu.dimension_semantics<parallel>], iteration_bounds = array<i64: 1, 1>, scalar_prefetch = 0 : i64, scratch_operands = 0 : i64, tpu.core_type = #tpu.core_type<tc>, window_params = [{transform_indices = @transform_0, window_bounds = array<i64: 16, 32>}, {pipeline_mode = #tpu.pipeline_mode<synchronous>, transform_indices = @transform_1, window_bounds = array<i64: 1, 32>}, {pipeline_mode = #tpu.pipeline_mode<synchronous>, transform_indices = @transform_2, window_bounds = array<i64: 1, 32>}, {pipeline_mode = #tpu.pipeline_mode<synchronous>, transform_indices = @transform_3, window_bounds = array<i64: 32, 32>}, {pipeline_mode = #tpu.pipeline_mode<synchronous>, transform_indices = @transform_4, window_bounds = array<i64: 1, 32>}, {transform_indices = @transform_5, window_bounds = array<i64: 16, 32>}]} {
    %c0 = arith.constant 0 : index
    %c0_0 = arith.constant 0 : index
    %0 = vector.load %arg2[%c0, %c0_0] : memref<16x32xf32, #tpu.memory_space<vmem>>, vector<16x32xf32>
    %cst = arith.constant dense<0.000000e+00> : vector<16xf32>
    %1 = vector.multi_reduction <add>, %0, %cst [1] : vector<16x32xf32> to vector<16xf32>
    %2 = vector.shape_cast %1 : vector<16xf32> to vector<16x1xf32>
    %cst_1 = arith.constant 3.200000e+01 : f32
    %3 = vector.broadcast %cst_1 : f32 to vector<16x1xf32>
    %4 = arith.divf %2, %3 : vector<16x1xf32>
    %5 = arith.mulf %0, %0 : vector<16x32xf32>
    %cst_2 = arith.constant dense<0.000000e+00> : vector<16xf32>
    %6 = vector.multi_reduction <add>, %5, %cst_2 [1] : vector<16x32xf32> to vector<16xf32>
    %7 = vector.shape_cast %6 : vector<16xf32> to vector<16x1xf32>
    %cst_3 = arith.constant 3.200000e+01 : f32
    %8 = vector.broadcast %cst_3 : f32 to vector<16x1xf32>
    %9 = arith.divf %7, %8 : vector<16x1xf32>
    %10 = arith.mulf %4, %4 : vector<16x1xf32>
    %11 = arith.subf %9, %10 : vector<16x1xf32>
    %cst_4 = arith.constant 0.000000e+00 : f32
    %12 = vector.broadcast %cst_4 : f32 to vector<16x1xf32>
    %13 = arith.maximumf %11, %12 : vector<16x1xf32>
    %cst_5 = arith.constant 9.99999974E-6 : f32
    %14 = vector.broadcast %cst_5 : f32 to vector<16x1xf32>
    %15 = arith.addf %13, %14 : vector<16x1xf32>
    %16 = math.rsqrt %15 : vector<16x1xf32>
    %c0_6 = arith.constant 0 : index
    %c0_7 = arith.constant 0 : index
    %17 = vector.load %arg3[%c0_6, %c0_7] : memref<1x32xf32, #tpu.memory_space<vmem>>, vector<1x32xf32>
    %c0_8 = arith.constant 0 : index
    %c0_9 = arith.constant 0 : index
    %18 = vector.load %arg4[%c0_8, %c0_9] : memref<1x32xf32, #tpu.memory_space<vmem>>, vector<1x32xf32>
    %19 = vector.broadcast %4 : vector<16x1xf32> to vector<16x32xf32>
    %20 = arith.subf %0, %19 : vector<16x32xf32>
    %21 = vector.broadcast %16 : vector<16x1xf32> to vector<16x32xf32>
    %22 = arith.mulf %20, %21 : vector<16x32xf32>
    %23 = vector.broadcast %17 : vector<1x32xf32> to vector<16x32xf32>
    %24 = arith.mulf %22, %23 : vector<16x32xf32>
    %25 = vector.broadcast %18 : vector<1x32xf32> to vector<16x32xf32>
    %26 = arith.addf %24, %25 : vector<16x32xf32>
    %c0_10 = arith.constant 0 : index
    %c0_11 = arith.constant 0 : index
    %27 = vector.load %arg5[%c0_10, %c0_11] : memref<32x32xf32, #tpu.memory_space<vmem>>, vector<32x32xf32>
    %cst_12 = arith.constant dense<0.000000e+00> : vector<16x32xf32>
    %28 = tpu.matmul %26, %27, %cst_12 {dimension_numbers = #tpu.dot_dimension_numbers<[1], [0], [0], [1], [0, 0, 1, 1], [], []>} : vector<16x32xf32>, vector<32x32xf32>, vector<16x32xf32> -> vector<16x32xf32>
    %c0_13 = arith.constant 0 : index
    %c0_14 = arith.constant 0 : index
    %29 = vector.load %arg6[%c0_13, %c0_14] : memref<1x32xf32, #tpu.memory_space<vmem>>, vector<1x32xf32>
    %30 = vector.broadcast %29 : vector<1x32xf32> to vector<16x32xf32>
    %31 = arith.addf %28, %30 : vector<16x32xf32>
    %c0_15 = arith.constant 0 : index
    %c0_16 = arith.constant 0 : index
    %32 = vector.load %arg7[%c0_15, %c0_16] : memref<16x32xf32, #tpu.memory_space<vmem>>, vector<16x32xf32>
    tpu.vector_store %arg7[%c0_15, %c0_16], %31 {strides = array<i32>} : memref<16x32xf32, #tpu.memory_space<vmem>>, vector<16x32xf32>,
    return
  }
  func.func @transform_0(%arg0: i32, %arg1: i32) -> (i32, i32) {
    %c0_i32 = arith.constant 0 : i32
    %c0_i32_0 = arith.constant 0 : i32
    return %arg1, %c0_i32 : i32, i32
  }
  func.func @transform_1(%arg0: i32, %arg1: i32) -> (i32, i32) {
    %c0_i32 = arith.constant 0 : i32
    %c0_i32_0 = arith.constant 0 : i32
    %c0_i32_1 = arith.constant 0 : i32
    return %c0_i32, %c0_i32_0 : i32, i32
  }
  func.func @transform_2(%arg0: i32, %arg1: i32) -> (i32, i32) {
    %c0_i32 = arith.constant 0 : i32
    %c0_i32_0 = arith.constant 0 : i32
    %c0_i32_1 = arith.constant 0 : i32
    return %c0_i32, %c0_i32_0 : i32, i32
  }
  func.func @transform_3(%arg0: i32, %arg1: i32) -> (i32, i32) {
    %c0_i32 = arith.constant 0 : i32
    %c0_i32_0 = arith.constant 0 : i32
    return %c0_i32, %arg0 : i32, i32
  }
  func.func @transform_4(%arg0: i32, %arg1: i32) -> (i32, i32) {
    %c0_i32 = arith.constant 0 : i32
    %c0_i32_0 = arith.constant 0 : i32
    return %c0_i32, %arg0 : i32, i32
  }
  func.func @transform_5(%arg0: i32, %arg1: i32) -> (i32, i32) {
    %c0_i32 = arith.constant 0 : i32
    return %arg1, %arg0 : i32, i32
  }
}

</mosaic_0001>

<bundles_post_ra>
// kernel: tpu_custom_call.1
= control target key start
LH: loop header
LB: loop body
LE: loop exit
PB: predicated region body
PF: predicated region fallthrough
CT: control target
= control target key end

     0   :  { %10 = vsyncpa [#allocation3], 0  ;;  %s423_s0 = inlined_call_operand.hbm [shape: f32[16,32], index: 0, kind: input, shape index: {}]   ;;  %s424_s1 = inlined_call_operand.vmem [shape: f32[1,32], index: 1, kind: input, shape index: {}]   ;;  %s425_s2 = inlined_call_operand.vmem [shape: f32[1,32], index: 2, kind: input, shape index: {}]   ;;  %s426_s3 = inlined_call_operand.hbm [shape: f32[32,32], index: 3, kind: input, shape index: {}]   ;;  %s427_s4 = inlined_call_operand.vmem [shape: f32[1,32], index: 4, kind: input, shape index: {}]   ;;  %s428_s5 = inlined_call_operand.hbm [shape: f32[16,32], index: 5, kind: output, shape index: {}]  }
   0x1   :  { %11 = vsyncpa [#allocation6], 0 }
   0x2   :  { %12 = vsyncpa [#allocation4], 0  ;;  %s326_s18 = smov [#allocation2]   ;;  %s254_s22 = scalar_lea.hbm %s423_s0, 256 }
   0x3   :  { %s18_s19 = sshll.u32 %s326_s18, 4  ;;  %p255_p0 = scmp.ne.s32.totalorder %s423_s0, %s254_s22  ;;  %s19_s19 = int_to_ptr.vmem [resolvable:$true] %s18_s19 }
   0x4   :  { %p258_p1 = scmp.lt.u32.totalorder %s254_s22, %s423_s0 }
   0x6   :  { %p260_p2 = pnand %p258_p1, %p255_p0 }
   0x8   :  { %263 = shalt.err (!%p260_p2)
}
   0x9   :  { %s264_s27 = scalar_lea.vmem %s19_s19, 256  ;;  %p269_p4 = scmp.lt.s32.totalorder %s19_s19, %s19_s19 }
   0xa   :  { %p265_p3 = scmp.ne.s32.totalorder %s19_s19, %s264_s27  ;;  %p270_p5 = scmp.lt.s32.totalorder %s264_s27, %s264_s27 }
   0xc   :  { %p271_p6 = por %p270_p5, %p269_p4 }
   0xe   :  { %p272_p7 = pnand %p271_p6, %p265_p3 }
  0x10   :  { %275 = shalt.err (!%p272_p7)
}
  0x11   :  { %s327_s28 = smov 128   ;;  %s328_s29 = smov 8  }
  0x12   :  { %24 = dma.hbm_to_vmem [thread:$0]  %s423_s0, 256, %s19_s19, [#allocation3], %s327_s28, %s327_s28, %s328_s29  }
  0x13   :  { %s329_s7 = smov [#allocation5]   ;;  %s276_s11 = scalar_lea.hbm %s426_s3, 512 }
  0x14   :  { %s34_s8 = sshll.u32 %s329_s7, 4  ;;  %p277_p8 = scmp.ne.s32.totalorder %s426_s3, %s276_s11  ;;  %s35_s8 = int_to_ptr.vmem [resolvable:$true] %s34_s8 }
  0x15   :  { %p280_p9 = scmp.lt.u32.totalorder %s276_s11, %s426_s3 }
  0x17   :  { %p282_p10 = pnand %p280_p9, %p277_p8 }
  0x19   :  { %285 = shalt.err (!%p282_p10)
}
  0x1a   :  { %s286_s16 = scalar_lea.vmem %s35_s8, 512  ;;  %p291_p12 = scmp.lt.s32.totalorder %s35_s8, %s35_s8 }
  0x1b   :  { %p287_p11 = scmp.ne.s32.totalorder %s35_s8, %s286_s16  ;;  %p292_p13 = scmp.lt.s32.totalorder %s286_s16, %s286_s16 }
  0x1d   :  { %p293_p0 = por %p292_p13, %p291_p12 }
  0x1f   :  { %p294_p1 = pnand %p293_p0, %p287_p11 }
  0x21   :  { %297 = shalt.err (!%p294_p1)
}
  0x22   :  { %40 = dma.hbm_to_vmem [thread:$0]  %s426_s3, 512, %s35_s8, [#allocation6], %s327_s28, %s327_s28, %s328_s29  }
  0x23   :  { %320 = dma.done.wait [#allocation3], 256  }
  0x24   :  { %321 = vsyncadd [#allocation3], 4294967040 }
  0x25   :  { %322 = dma.done.wait [#allocation6], 512  }
  0x26   :  { %323 = vsyncadd [#allocation6], 4294966784  ;;  %vm51_vm0 = vcmask 261120   ;;  %v49_v0 = vld [vmem:[#allocation2] sm:$0xff]  ;;  %v50_v1 = vld [vmem:[#allocation2 + $0x8] sm:$0xff] }
  0x27   :  { %v52_v2 = vsel %vm51_vm0, %v49_v0, 0.0  ;;  %v61_v3 = vmul.f32 %v49_v0, %v49_v0  ;;  %v62_v4 = vmul.f32 %v50_v1, %v50_v1  ;;  %v55_v6 = vsel %vm51_vm0, %v50_v1, 0.0  ;;  %v103_v8 = vld [vmem:[#allocation5] sm:$0xff]  ;;  %v104_v9 = vld [vmem:[#allocation5 + $0x8] sm:$0xff]  ;;  %v105_v10 = vld [vmem:[#allocation5 + $0x10] sm:$0xff] }
  0x28   :  { %53 = vadd.xlane.f32.xlu0 %v52_v2  ;;  %v237_v11 = vpack.c.bf16 %v104_v9, %v103_v8  ;;  %v106_v12 = vld [vmem:[#allocation5 + $0x18] sm:$0xff]  ;;  %v215_v32 = vld [vmem:[%s424_s1] ss:$0 sm:$0xff]  ;;  %s330_s1 = smov [#allocation7]  }
  0x29   :  { %v63_v5 = vsel %vm51_vm0, %v61_v3, 0.0  ;;  %v66_v7 = vsel %vm51_vm0, %v62_v4, 0.0  ;;  %v241_v13 = vpack.c.bf16 %v106_v12, %v105_v10  ;;  %v216_v34 = vld [vmem:[%s425_s2] ss:$0 sm:$0xff]  ;;  %s202_s23 = sshll.u32 %s330_s1, 4  ;;  %s203_s23 = int_to_ptr.vmem [resolvable:$true] %s202_s23 }
  0x2a   :  { %64 = vadd.xlane.f32.xlu1 %v63_v5  ;;  %238 = vmatprep.subr.bf16.mxu0 %v237_v11  ;;  %v217_v42 = vld [vmem:[%s427_s4] ss:$0 sm:$0xff]  ;;  %s298_s2 = scalar_lea.vmem %s203_s23, 256  ;;  %p303_p3 = scmp.lt.s32.totalorder %s203_s23, %s203_s23 }
  0x2b   :  { %240 = vmatpush3.bf16.msra.mxu0 %v237_v11  ;;  %p299_p2 = scmp.ne.s32.totalorder %s203_s23, %s298_s2  ;;  %p304_p4 = scmp.lt.s32.totalorder %s298_s2, %s298_s2 }
  0x2c   :  { %56 = vadd.xlane.f32.xlu0 %v55_v6  ;;  %242 = vmatprep.subr.bf16.mxu0 %v241_v13 }
  0x2d   :  { %p305_p5 = por %p304_p4, %p303_p3 }
  0x2e   :  { %67 = vadd.xlane.f32.xlu1 %v66_v7 }
  0x2f   :  { %244 = vmatpush3.bf16.msra.mxu0 %v241_v13  ;;  %p306_p6 = pnand %p305_p5, %p299_p2 }
  0xb5   :  { %v54_v14 = vpop.xlane.xlu0 %53 }
  0xb6   :  { %v59_v15 = vmul.f32 0.03125, %v54_v14 }
  0xb7   :  { %v65_v16 = vpop.xlane.xlu1 %64 }
  0xb8   :  { %v71_v17 = vmul.f32 %v59_v15, %v59_v15  ;;  %v69_v18 = vmul.f32 0.03125, %v65_v16  ;;  %v83_v30 = vsub.f32 %v49_v0, %v59_v15 }
  0xb9   :  { %v57_v19 = vpop.xlane.xlu0 %56 }
  0xba   :  { %v73_v20 = vsub.f32 %v69_v18, %v71_v17  ;;  %v60_v21 = vmul.f32 0.03125, %v57_v19 }
  0xbb   :  { %v68_v22 = vpop.xlane.xlu1 %67 }
  0xbc   :  { %v75_v23 = vmax.f32 %v73_v20, 0.0  ;;  %v72_v24 = vmul.f32 %v60_v21, %v60_v21  ;;  %v70_v25 = vmul.f32 0.03125, %v68_v22  ;;  %v84_v35 = vsub.f32 %v50_v1, %v60_v21 }
  0xbe   :  { %v77_v26 = vadd.f32 1e-05, %v75_v23  ;;  %v74_v27 = vsub.f32 %v70_v25, %v72_v24 }
  0xc0   :  { %250 = vrsqrt.f32 %v77_v26  ;;  %v76_v28 = vmax.f32 %v74_v27, 0.0 }
  0xc2   :  { %v78_v29 = vadd.f32 1e-05, %v76_v28 }
  0xc4   :  { %252 = vrsqrt.f32 %v78_v29 }
  0xca   :  { %v251_v31 = vpop.eup %250 }
  0xcb   :  { %v85_v33 = vmul.f32 %v251_v31, %v83_v30 }
  0xcd   :  { %v93_v36 = vmul.f32 %v215_v32, %v85_v33 }
  0xce   :  { %v253_v37 = vpop.eup %252 }
  0xcf   :  { %v86_v38 = vmul.f32 %v253_v37, %v84_v35  ;;  %v101_v39 = vadd.f32 %v216_v34, %v93_v36 }
  0xd1   :  { %v94_v40 = vmul.f32 %v215_v32, %v86_v38  ;;  %234 = vmatprep.mubr.msk.f32.mxu0 %vm51_vm0, %v101_v39 }
  0xd3   :  { %v102_v41 = vadd.f32 %v216_v34, %v94_v40 }
  0xd5   :  { %235 = vmatmul.mubr.msk.f32.vlgmr.msra.gmra.mrb[0].mxu0 %vm51_vm0, %v102_v41 }
 0x1a8   :  { %v236_v43 = vpop.f32.mrb[0].mxu0 }
 0x1a9   :  { %v192_v44 = vadd.f32 %v236_v43, %v217_v42  ;;  %v186_v45 = vpop.f32.mrb[1].mxu0 }
 0x1aa   :  { %v187_v46 = vadd.f32 %v217_v42, %v186_v45 }
 0x1ab   :  { %196 = vst.msk [vmem:[#allocation7 + $0x8] sm:$0xff] %vm51_vm0, %v192_v44 }
 0x1ac   :  { %195 = vst.msk [vmem:[#allocation7] sm:$0xff] %vm51_vm0, %v187_v46 }
 0x1ad   :  { %309 = shalt.err (!%p306_p6)
}
 0x1ae   :  { %s310_s25 = scalar_lea.hbm %s428_s5, 256 }
 0x1af   :  { %p311_p7 = scmp.ne.s32.totalorder %s428_s5, %s310_s25  ;;  %p314_p8 = scmp.lt.u32.totalorder %s310_s25, %s428_s5 }
 0x1b1   :  { %p316_p9 = pnand %p314_p8, %p311_p7 }
 0x1b3   :  { %319 = shalt.err (!%p316_p9)
}
 0x1b4   :  { %208 = dma.vmem_to_hbm [thread:$0]  %s203_s23, 256, %s428_s5, [#allocation4], %s327_s28, %s327_s28, %s328_s29  }
 0x1b5   :  { %324 = dma.done.wait [#allocation4], 256  }
 0x1b6   :  { %325 = vsyncadd [#allocation4], 4294967040 }
 0x1b7   :  { %212 = vsyncpa [#allocation3], 1 }
 0x1b8   :  { %213 = vsyncpa [#allocation6], 1 }
 0x1b9   :  { %214 = vsyncpa [#allocation4], 1 }

</bundles_post_ra>
